<compile_context>
chip_gen: v6e
topology: v6e:2x2x1
jax: 0.10.0
libtpu: 0.0.40
codegen_flags: <defaults>
</compile_context>

<pallas_src>
import jax
import jax.numpy as jnp
from jax.experimental import pallas as pl
from jax.experimental.pallas import tpu as pltpu


def _identity_kernel(x_ref, o_ref):
    # Pure elementwise passthrough on the current VMEM tile.
    o_ref[...] = x_ref[...]


def _tile_budget():
    """(tile_bytes, vmem_limit_bytes) per TPU generation.

    4 MiB tiles => 16 MiB of double-buffered in+out buffers on v6e/v7x (under
    their 32 MiB scoped-VMEM default, made explicit via vmem_limit_bytes).
    2 MiB tiles (8 MiB of buffers) on v5e (16 MiB scoped default) and on
    anything we cannot identify.
    """
    try:
        kind = jax.devices()[0].device_kind.lower()
    except Exception:
        kind = ""
    if ("v6" in kind) or ("v7" in kind):
        return 4 << 20, 32 << 20
    return 2 << 20, None


def _pallas_copy(x, *, alias_input=False):
    """Tiled identity copy of `x`, whose last dim is a multiple of 128.

    Leading dims (all but the last two) become grid axes; the second-to-last
    dim is row-blocked with a byte-budgeted tile.  The last dim is never split,
    so every store is a full-width (lane-dense) vst.
    """
    shape = x.shape
    assert len(shape) >= 2 and shape[-1] % 128 == 0 and shape[-1] > 0
    *lead, S, L = shape
    n_lead = len(lead)
    itemsize = x.dtype.itemsize
    # Sublane multiple: 8 for 32-bit, 16 for 16-bit, 32 for 8-bit dtypes
    # (sub-32-bit dtypes pack along sublanes).
    sublane_mult = 8 * max(1, 4 // itemsize)
    total_bytes = x.size * itemsize

    tile_bytes, vmem_limit = _tile_budget()

    # Row block: biggest multiple of sublane_mult under the byte budget
    # (amortizes the ~0.35us per-grid-step overhead, stays well under scoped
    # VMEM with in/out double-buffering).
    tm = (tile_bytes // (L * itemsize)) // sublane_mult * sublane_mult
    tm = max(sublane_mult, tm)
    if tm >= S:
        tm = S                                    # full-dim block is always legal

    lead_steps = 1
    for d in lead:
        lead_steps *= d

    # Arrays > ~1 MiB: keep >= 4 grid steps so block i+1's DMA-in overlaps
    # block i's DMA-out (read/write stream overlap; up to ~2x for 2-16 MiB).
    if total_bytes > (1 << 20) and lead_steps * pl.cdiv(S, tm) < 4:
        want_rows = -(-4 // lead_steps)           # ceil(4 / lead_steps)
        cap = (S // want_rows) // sublane_mult * sublane_mult
        if cap >= sublane_mult:
            tm = min(tm, cap)

    grid = tuple(lead) + (pl.cdiv(S, tm),)
    # Leading dims squeezed out of the kernel view; kernel sees (tm, L).
    block_shape = (None,) * n_lead + (tm, L)

    def index_map(*idx):                          # idx = (*lead_ids, row_block)
        return idx[:-1] + (idx[-1], 0)

    return pl.pallas_call(
        _identity_kernel,
        out_shape=jax.ShapeDtypeStruct(shape, x.dtype),
        grid_spec=pltpu.PrefetchScalarGridSpec(
            num_scalar_prefetch=0,
            grid=grid,
            in_specs=[pl.BlockSpec(block_shape, index_map)],
            out_specs=pl.BlockSpec(block_shape, index_map),
        ),
        compiler_params=pltpu.CompilerParams(
            # 'parallel' on every axis: each output block is written once; on
            # v7x this lets the grid shard across both TensorCores.
            dimension_semantics=("parallel",) * len(grid),
            vmem_limit_bytes=vmem_limit,
        ),
        # With jit + donate_argnums on the caller side, this lets XLA reuse the
        # input HBM buffer for the output (halves peak footprint).  Without
        # donation XLA inserts a defensive copy, so it is opt-in.
        input_output_aliases=({0: 0} if alias_input else {}),
    )(x)


def _identity_copy(x, *, alias_input=False):
    """Pallas passthrough copy of `x` (the force_copy test path)."""
    shape = x.shape

    # Path A: native last dim already lane-dense -> no wrapper reshape at all
    # (avoids any hidden XLA relayout around the pallas custom call).
    if x.ndim >= 2 and shape[-1] > 0 and shape[-1] % 128 == 0:
        return _pallas_copy(x, alias_input=alias_input)

    # Path B: last dim is sub-128 / not a multiple of 128.  Flatten and
    # lane-pack so stores are unmasked full-width vst (biggest single measured
    # lever for copy-class kernels); pad the tail up to a 128 multiple if the
    # element count has no 128-multiple factorization.
    total = x.size
    flat = x.reshape(total)
    lanes = None
    for cand in (1024, 512, 256, 128):
        if total % cand == 0:
            lanes = cand
            break
    if lanes is None:
        lanes = 128
        padded = pl.cdiv(total, lanes) * lanes
        flat = jnp.pad(flat, (0, padded - total))
    x2 = flat.reshape(flat.size // lanes, lanes)

    out2 = _pallas_copy(x2, alias_input=alias_input)

    out = out2.reshape(out2.size)
    if out.size != total:
        out = out[:total]
    return out.reshape(shape)


def print_layer(x, force_copy=False, alias_input=False):
    """Pallas implementation of PrintLayer.forward: print shape, return x.

    NOTE: under jax.jit the Python print fires at trace time only (shapes are
    static, so the printed information matches the PyTorch module); use
    jax.debug.print if a per-execution print is required.
    """
    print('p', tuple(x.shape))
    if not force_copy:
        # Identity op: returning x directly avoids 2x the array size in HBM
        # traffic plus launch/pipeline overhead (primary optimization).
        return x
    return _identity_copy(x, alias_input=alias_input)


if __name__ == "__main__":
    key = jax.random.PRNGKey(0)
    k1, k2, k3 = jax.random.split(key, 3)

    # Small NCHW input consistent with the module's usage in a conv net.
    x = jax.random.normal(k1, (2, 4, 16, 16), dtype=jnp.float32)

    # 1) Default path: pure identity, no kernel launch / no HBM traffic.
    y = jax.block_until_ready(print_layer(x))
    assert y.shape == x.shape and y.dtype == x.dtype
    assert bool(jnp.all(y == x))

    # 2) Kernel path B: last dim (16) not lane-dense -> flatten + lane-pack.
    y = jax.block_until_ready(print_layer(x, force_copy=True))
    assert y.shape == x.shape and y.dtype == x.dtype
    assert bool(jnp.all(y == x))

    # 3) Kernel path A: last dim already a 128-multiple -> no wrapper reshape,
    #    leading dims folded into the grid via BlockSpec.
    xt = jax.random.normal(k2, (2, 8, 128), dtype=jnp.float32)
    yt = jax.block_until_ready(print_layer(xt, force_copy=True))
    assert yt.shape == xt.shape and yt.dtype == xt.dtype
    assert bool(jnp.all(yt == xt))

    # 3b) bf16 sanity check (sublane packing multiple = 16).
    xb = jax.random.normal(k3, (2, 16, 256), dtype=jnp.float32).astype(jnp.bfloat16)
    yb = jax.block_until_ready(print_layer(xb, force_copy=True))
    assert yb.shape == xb.shape and yb.dtype == xb.dtype
    assert bool(jnp.all(yb == xb))

    # 4) jit + donation: input_output_aliases lets XLA reuse the input buffer.
    copy_donated = jax.jit(
        lambda a: print_layer(a, force_copy=True, alias_input=True),
        donate_argnums=0)
    x_donate = x + 0.0                      # separate, donatable buffer
    yd = jax.block_until_ready(copy_donated(x_donate))
    assert yd.shape == x.shape and yd.dtype == x.dtype
    assert bool(jnp.all(yd == x))

    print("KERNEL_OK")
</pallas_src>

<mosaic_0001>
module attributes {stable_mosaic.version = 11 : i64} {
  func.func @_identity_kernel(%arg0: i32, %arg1: memref<2x1024xf32, #tpu.memory_space<vmem>>, %arg2: memref<2x1024xf32, #tpu.memory_space<vmem>>) attributes {dimension_semantics = [#tpu.dimension_semantics<parallel>], iteration_bounds = array<i64: 1>, scalar_prefetch = 0 : i64, scratch_operands = 0 : i64, tpu.core_type = #tpu.core_type<tc>, window_params = [{transform_indices = @transform_0, window_bounds = array<i64: 2, 1024>}, {transform_indices = @transform_1, window_bounds = array<i64: 2, 1024>}]} {
    %c0 = arith.constant 0 : index
    %c0_0 = arith.constant 0 : index
    %0 = vector.load %arg1[%c0, %c0_0] : memref<2x1024xf32, #tpu.memory_space<vmem>>, vector<2x1024xf32>
    %c0_1 = arith.constant 0 : index
    %c0_2 = arith.constant 0 : index
    %1 = vector.load %arg2[%c0_1, %c0_2] : memref<2x1024xf32, #tpu.memory_space<vmem>>, vector<2x1024xf32>
    tpu.vector_store %arg2[%c0_1, %c0_2], %0 {strides = array<i32>} : memref<2x1024xf32, #tpu.memory_space<vmem>>, vector<2x1024xf32>,
    return
  }
  func.func @transform_0(%arg0: i32) -> (i32, i32) {
    %c0_i32 = arith.constant 0 : i32
    %c0_i32_0 = arith.constant 0 : i32
    return %arg0, %c0_i32 : i32, i32
  }
  func.func @transform_1(%arg0: i32) -> (i32, i32) {
    %c0_i32 = arith.constant 0 : i32
    %c0_i32_0 = arith.constant 0 : i32
    return %arg0, %c0_i32 : i32, i32
  }
}

</mosaic_0001>

<bundles_post_ra>
// kernel: tpu_custom_call.1
= control target key start
LH: loop header
LB: loop body
LE: loop exit
PB: predicated region body
PF: predicated region fallthrough
CT: control target
= control target key end

     0   :  { %6 = vsyncpa [#allocation3], 0  ;;  %s104_s0 = inlined_call_operand.hbm [shape: f32[2,1024], index: 0, kind: input, shape index: {}]   ;;  %s105_s1 = inlined_call_operand.hbm [shape: f32[2,1024], index: 1, kind: output, shape index: {}]  }
   0x1   :  { %7 = vsyncpa [#allocation4], 0  ;;  %s86_s6 = smov [#allocation2]  }
   0x2   :  { %s14_s7 = sshll.u32 %s86_s6, 4  ;;  %s15_s7 = int_to_ptr.vmem [resolvable:$true] %s14_s7 }
   0x3   :  { %s50_s8 = scalar_lea.vmem %s15_s7, 256  ;;  %p55_p1 = scmp.lt.s32.totalorder %s15_s7, %s15_s7 }
   0x4   :  { %p51_p0 = scmp.ne.s32.totalorder %s15_s7, %s50_s8  ;;  %p56_p2 = scmp.lt.s32.totalorder %s50_s8, %s50_s8 }
   0x6   :  { %p57_p3 = por %p56_p2, %p55_p1 }
   0x8   :  { %p58_p4 = pnand %p57_p3, %p51_p0 }
   0xa   :  { %61 = shalt.err (!%p58_p4)
}
   0xb   :  { %17 = dma.hbm_to_vmem [thread:$0]  %s104_s0, 256, %s15_s7, [#allocation3]  }
   0xc   :  { %82 = dma.done.wait [#allocation3], 256  }
   0xd   :  { %83 = vsyncadd [#allocation3], 4294967040  ;;  %s87_s11 = smov [#allocation5]   ;;  %v21_v0 = vld [vmem:[#allocation2] sm:$0xff]  ;;  %v22_v1 = vld [vmem:[#allocation2 + $0x8] sm:$0xff] }
   0xe   :  { %s31_s12 = sshll.u32 %s87_s11, 4  ;;  %23 = vst [vmem:[#allocation5] sm:$0xff] %v21_v0  ;;  %24 = vst [vmem:[#allocation5 + $0x8] sm:$0xff] %v22_v1  ;;  %s32_s12 = int_to_ptr.vmem [resolvable:$true] %s31_s12 }
   0xf   :  { %s62_s13 = scalar_lea.vmem %s32_s12, 256  ;;  %p67_p6 = scmp.lt.s32.totalorder %s32_s12, %s32_s12 }
  0x10   :  { %p63_p5 = scmp.ne.s32.totalorder %s32_s12, %s62_s13  ;;  %p68_p7 = scmp.lt.s32.totalorder %s62_s13, %s62_s13 }
  0x12   :  { %p69_p8 = por %p68_p7, %p67_p6 }
  0x14   :  { %p70_p9 = pnand %p69_p8, %p63_p5 }
  0x16   :  { %73 = shalt.err (!%p70_p9)
}
  0x17   :  { %34 = dma.vmem_to_hbm [thread:$0]  %s32_s12, 256, %s105_s1, [#allocation4]  }
  0x18   :  { %84 = dma.done.wait [#allocation4], 256  }
  0x19   :  { %85 = vsyncadd [#allocation4], 4294967040 }
  0x1a   :  { %38 = vsyncpa [#allocation3], 1 }
  0x1b   :  { %39 = vsyncpa [#allocation4], 1 }

</bundles_post_ra>
